<compile_context>
chip_gen: v7x
topology: tpu7x:2x2x1
jax: 0.10.0
libtpu: 0.0.40
codegen_flags: <defaults>
</compile_context>

<pallas_src>
import jax
import jax.numpy as jnp
from jax.experimental import pallas as pl
from jax.experimental.pallas import tpu as pltpu


LANE = 128


def _round_up(n: int, m: int) -> int:
    return ((n + m - 1) // m) * m


def _pad_to(a, shape):
    return jnp.pad(a, [(0, t - s) for s, t in zip(a.shape, shape)])


def _dqn_kernel(x_ref, w1_ref, b1_ref, w2_ref, b2_ref, w3_ref, b3_ref,
                w4_ref, b4_ref, o_ref):
    wdt = w1_ref.dtype
    # x = x.float() (or the low-precision streaming dtype on the bf16 path).
    # All matmuls accumulate in f32 on the MXU; bias/relu stay f32 on the VPU.
    x = x_ref[...].astype(wdt)

    h = jnp.dot(x, w1_ref[...], preferred_element_type=jnp.float32) + b1_ref[...]
    h = jnp.maximum(h, 0.0)
    h = jnp.dot(h.astype(wdt), w2_ref[...],
                preferred_element_type=jnp.float32) + b2_ref[...]
    h = jnp.maximum(h, 0.0)
    h = jnp.dot(h.astype(wdt), w3_ref[...],
                preferred_element_type=jnp.float32) + b3_ref[...]
    h = jnp.maximum(h, 0.0)

    # fc4: padded w4 columns are zero and the padded b4 lanes carry -1e30, so
    # the padded logits are already the log_softmax mask (no iota/where).
    logits = jnp.dot(h.astype(wdt), w4_ref[...],
                     preferred_element_type=jnp.float32) + b4_ref[...]

    # log_softmax over dim=1 (numerically stable; padded lanes -> exp ~ 0).
    m = jnp.max(logits, axis=1, keepdims=True)
    z = logits - m
    lse = jnp.log(jnp.sum(jnp.exp(z), axis=1, keepdims=True))
    out = z - lse

    # Narrow writeback: the out block is (TB, outputs), so only valid columns
    # hit HBM and no post-kernel lane slice is needed.
    o_ref[...] = out[:, :o_ref.shape[1]].astype(o_ref.dtype)


def dqn_forward(x, params, *, block_batch=2048, weights_dtype=jnp.float32):
    """Forward pass of the DQN module.

    params: w1..w4 stored as (in, out), b1..b4 as (1, out); the kernel
    computes x @ W + b (PyTorch nn.Linear with W transposed).
    weights_dtype: jnp.float32 (exact) or jnp.bfloat16 (v6e/v7x fast path,
    f32 accumulation).  Biases and all elementwise math stay f32.
    """
    B, inputs = x.shape
    hidden = params["w1"].shape[1]
    outputs = params["w4"].shape[1]

    H = _round_up(hidden, LANE)       # lane-dense hidden width
    OP = _round_up(outputs, LANE)     # lane-dense (compute-side) output width

    wdt = jnp.dtype(weights_dtype)
    # Zero-padded hidden columns are inert through matmul + relu (padded bias
    # entries are zero).  b4's padded lanes carry the log_softmax mask.
    w1 = _pad_to(params["w1"].astype(wdt), (inputs, H))
    w2 = _pad_to(params["w2"].astype(wdt), (H, H))
    w3 = _pad_to(params["w3"].astype(wdt), (H, H))
    w4 = _pad_to(params["w4"].astype(wdt), (H, OP))
    b1 = _pad_to(params["b1"].astype(jnp.float32), (1, H))
    b2 = _pad_to(params["b2"].astype(jnp.float32), (1, H))
    b3 = _pad_to(params["b3"].astype(jnp.float32), (1, H))
    b4 = jnp.pad(params["b4"].astype(jnp.float32),
                 ((0, 0), (0, OP - outputs)), constant_values=-1e30)
    # TODO(synk): callers can also stream x in bfloat16 (halves input HBM
    # bytes); the kernel casts at the dot input either way.

    # Per-generation VMEM budget (~40% of physical leaves pipeline/compiler
    # headroom; v7x only has 64 MiB per TensorCore).
    try:
        vmem_cap = pltpu.get_tpu_info().vmem_capacity_bytes
    except Exception:  # pragma: no cover - conservative fallback
        vmem_cap = 64 * 1024 * 1024
    budget = int(0.4 * vmem_cap)

    x_item = jnp.dtype(x.dtype).itemsize

    def _vmem_bytes(tb):
        def tile(r, c, item):
            return _round_up(r, 8) * _round_up(c, LANE) * item
        weights = (tile(inputs, H, wdt.itemsize) + 2 * tile(H, H, wdt.itemsize)
                   + tile(H, OP, wdt.itemsize)
                   + 3 * tile(1, H, 4) + tile(1, OP, 4))
        io = 2 * tile(tb, inputs, x_item) + 2 * tile(tb, outputs, 4)
        acts = 4 * tile(tb, H, 4)
        # Constant-index weights are still double-buffered by the pipeline
        # (tiny at H=128; pl.Buffered(1) only worth it for large hidden).
        return 2 * weights + io + acts

    # Batch tile: big tiles amortize the ~0.35us/step overhead.  Keep a
    # multiple of 8 sublanes; the default (2048) is also a multiple of 256
    # (MXU-native M on v6e/v7x) and 128 (v5e).
    TB = min(_round_up(block_batch, 8), _round_up(B, 8))
    # Split a large single-tile batch so both v7x TensorCores get a grid step.
    if TB >= 1024 and _round_up(B, TB) == TB:
        TB = _round_up(pl.cdiv(TB, 2), 8)
    # Shrink the tile if its footprint would blow the VMEM budget.
    while TB > 256 and _vmem_bytes(TB) > budget // 2:
        TB = _round_up(TB // 2, 8)

    B_pad = _round_up(B, TB)
    x_in = x if B_pad == B else jnp.pad(x, ((0, B_pad - B), (0, 0)))
    grid = (B_pad // TB,)

    def _resident(shape):
        # Same block index at every grid step -> stays VMEM-resident.
        return pl.BlockSpec(shape, lambda i: (0, 0))

    in_specs = [
        pl.BlockSpec((TB, inputs), lambda i: (i, 0)),   # x: tiled over batch
        _resident((inputs, H)), _resident((1, H)),
        _resident((H, H)), _resident((1, H)),
        _resident((H, H)), _resident((1, H)),
        _resident((H, OP)), _resident((1, OP)),
    ]
    out_specs = pl.BlockSpec((TB, outputs), lambda i: (i, 0))

    vmem_limit = int(max(16 * 1024 * 1024, min(budget, 2 * _vmem_bytes(TB))))

    weight_bytes = ((w1.size + w2.size + w3.size + w4.size) * wdt.itemsize
                    + (b1.size + b2.size + b3.size + b4.size) * 4)
    flops = 2 * B_pad * (inputs * H + 2 * H * H + H * OP)
    cost = pl.CostEstimate(
        flops=flops,
        transcendentals=B_pad * OP,
        bytes_accessed=(x_in.size * x_item + weight_bytes
                        + B_pad * outputs * 4),
    )

    out = pl.pallas_call(
        _dqn_kernel,
        out_shape=jax.ShapeDtypeStruct((B_pad, outputs), jnp.float32),
        grid=grid,
        in_specs=in_specs,
        out_specs=out_specs,
        compiler_params=pltpu.CompilerParams(
            dimension_semantics=("parallel",),
            vmem_limit_bytes=vmem_limit,
        ),
        cost_estimate=cost,
    )(x_in, w1, b1, w2, b2, w3, b3, w4, b4)

    return out if B_pad == B else out[:B]


def init_params(key, inputs, outputs):
    """Deterministic PyTorch-style init: U(-1/sqrt(fan_in), 1/sqrt(fan_in))."""
    val = int((inputs + outputs) / 2)
    dims = [(inputs, val), (val, val), (val, val), (val, outputs)]
    params = {}
    for i, (fan_in, fan_out) in enumerate(dims, start=1):
        key, kw, kb = jax.random.split(key, 3)
        bound = 1.0 / (fan_in ** 0.5)
        # stored as (in, out) so the kernel computes x @ W + b
        params[f"w{i}"] = jax.random.uniform(
            kw, (fan_in, fan_out), jnp.float32, -bound, bound)
        params[f"b{i}"] = jax.random.uniform(
            kb, (1, fan_out), jnp.float32, -bound, bound)
    return params


def dqn_reference(x, params):
    """Pure-JAX reference of the PyTorch forward for sanity checking."""
    h = x.astype(jnp.float32)
    h = jax.nn.relu(h @ params["w1"] + params["b1"])
    h = jax.nn.relu(h @ params["w2"] + params["b2"])
    h = jax.nn.relu(h @ params["w3"] + params["b3"])
    logits = h @ params["w4"] + params["b4"]
    return jax.nn.log_softmax(logits, axis=1)


if __name__ == "__main__":
    key = jax.random.PRNGKey(0)
    inputs, outputs = 32, 8   # val = (32 + 8) // 2 = 20

    kp, kx1, kx2, kx3 = jax.random.split(key, 4)
    params = init_params(kp, inputs, outputs)

    # 1) Small, spec-consistent shape (single grid step, no pad/slice).
    x1 = jax.random.normal(kx1, (8, inputs), dtype=jnp.float32)
    out1 = jax.block_until_ready(dqn_forward(x1, params))
    ref1 = dqn_reference(x1, params)
    assert out1.shape == (8, outputs)
    assert jnp.allclose(out1, ref1, atol=1e-4, rtol=1e-4), "mismatch (batch=8)"

    # 2) Multi-step grid, batch divisible by the tile -> zero-copy path.
    x2 = jax.random.normal(kx2, (256, inputs), dtype=jnp.float32)
    out2 = jax.block_until_ready(dqn_forward(x2, params, block_batch=128))
    ref2 = dqn_reference(x2, params)
    assert out2.shape == (256, outputs)
    assert jnp.allclose(out2, ref2, atol=1e-4, rtol=1e-4), "mismatch (batch=256)"

    # 3) Ragged batch -> pad-last-tile path (f32 exactness preserved).
    x3 = jax.random.normal(kx3, (300, inputs), dtype=jnp.float32)
    out3 = jax.block_until_ready(dqn_forward(x3, params, block_batch=128))
    ref3 = dqn_reference(x3, params)
    assert out3.shape == (300, outputs)
    assert jnp.allclose(out3, ref3, atol=1e-4, rtol=1e-4), "mismatch (batch=300)"

    # 4) bf16 weight streaming (v6e/v7x fast path), f32 accumulation.
    out4 = jax.block_until_ready(
        dqn_forward(x2, params, block_batch=128, weights_dtype=jnp.bfloat16))
    assert out4.shape == (256, outputs)
    assert jnp.allclose(out4, ref2, atol=5e-2, rtol=5e-2), "mismatch (bf16)"

    print("KERNEL_OK")
</pallas_src>

<mosaic_0001>
module attributes {stable_mosaic.version = 11 : i64} {
  func.func @_dqn_kernel(%arg0: i32, %arg1: memref<8x32xf32, #tpu.memory_space<vmem>>, %arg2: memref<32x128xf32, #tpu.memory_space<vmem>>, %arg3: memref<1x128xf32, #tpu.memory_space<vmem>>, %arg4: memref<128x128xf32, #tpu.memory_space<vmem>>, %arg5: memref<1x128xf32, #tpu.memory_space<vmem>>, %arg6: memref<128x128xf32, #tpu.memory_space<vmem>>, %arg7: memref<1x128xf32, #tpu.memory_space<vmem>>, %arg8: memref<128x128xf32, #tpu.memory_space<vmem>>, %arg9: memref<1x128xf32, #tpu.memory_space<vmem>>, %arg10: memref<8x8xf32, #tpu.memory_space<vmem>>) attributes {dimension_semantics = [#tpu.dimension_semantics<parallel>], iteration_bounds = array<i64: 1>, scalar_prefetch = 0 : i64, scratch_operands = 0 : i64, tpu.core_type = #tpu.core_type<tc>, window_params = [{transform_indices = @transform_0, window_bounds = array<i64: 8, 32>}, {pipeline_mode = #tpu.pipeline_mode<synchronous>, transform_indices = @transform_1, window_bounds = array<i64: 32, 128>}, {pipeline_mode = #tpu.pipeline_mode<synchronous>, transform_indices = @transform_2, window_bounds = array<i64: 1, 128>}, {pipeline_mode = #tpu.pipeline_mode<synchronous>, transform_indices = @transform_3, window_bounds = array<i64: 128, 128>}, {pipeline_mode = #tpu.pipeline_mode<synchronous>, transform_indices = @transform_4, window_bounds = array<i64: 1, 128>}, {pipeline_mode = #tpu.pipeline_mode<synchronous>, transform_indices = @transform_5, window_bounds = array<i64: 128, 128>}, {pipeline_mode = #tpu.pipeline_mode<synchronous>, transform_indices = @transform_6, window_bounds = array<i64: 1, 128>}, {pipeline_mode = #tpu.pipeline_mode<synchronous>, transform_indices = @transform_7, window_bounds = array<i64: 128, 128>}, {pipeline_mode = #tpu.pipeline_mode<synchronous>, transform_indices = @transform_8, window_bounds = array<i64: 1, 128>}, {transform_indices = @transform_9, window_bounds = array<i64: 8, 8>}]} {
    %c0 = arith.constant 0 : index
    %c0_0 = arith.constant 0 : index
    %0 = vector.load %arg1[%c0, %c0_0] : memref<8x32xf32, #tpu.memory_space<vmem>>, vector<8x32xf32>
    %c0_1 = arith.constant 0 : index
    %c0_2 = arith.constant 0 : index
    %1 = vector.load %arg2[%c0_1, %c0_2] : memref<32x128xf32, #tpu.memory_space<vmem>>, vector<32x128xf32>
    %cst = arith.constant dense<0.000000e+00> : vector<8x128xf32>
    %2 = tpu.matmul %0, %1, %cst {dimension_numbers = #tpu.dot_dimension_numbers<[1], [0], [0], [1], [0, 0, 1, 1], [], []>} : vector<8x32xf32>, vector<32x128xf32>, vector<8x128xf32> -> vector<8x128xf32>
    %c0_3 = arith.constant 0 : index
    %c0_4 = arith.constant 0 : index
    %3 = vector.load %arg3[%c0_3, %c0_4] : memref<1x128xf32, #tpu.memory_space<vmem>>, vector<1x128xf32>
    %4 = vector.broadcast %3 : vector<1x128xf32> to vector<8x128xf32>
    %5 = arith.addf %2, %4 : vector<8x128xf32>
    %cst_5 = arith.constant 0.000000e+00 : f32
    %6 = vector.broadcast %cst_5 : f32 to vector<8x128xf32>
    %7 = arith.maximumf %5, %6 : vector<8x128xf32>
    %c0_6 = arith.constant 0 : index
    %c0_7 = arith.constant 0 : index
    %8 = vector.load %arg4[%c0_6, %c0_7] : memref<128x128xf32, #tpu.memory_space<vmem>>, vector<128x128xf32>
    %cst_8 = arith.constant dense<0.000000e+00> : vector<8x128xf32>
    %9 = tpu.matmul %7, %8, %cst_8 {dimension_numbers = #tpu.dot_dimension_numbers<[1], [0], [0], [1], [0, 0, 1, 1], [], []>} : vector<8x128xf32>, vector<128x128xf32>, vector<8x128xf32> -> vector<8x128xf32>
    %c0_9 = arith.constant 0 : index
    %c0_10 = arith.constant 0 : index
    %10 = vector.load %arg5[%c0_9, %c0_10] : memref<1x128xf32, #tpu.memory_space<vmem>>, vector<1x128xf32>
    %11 = vector.broadcast %10 : vector<1x128xf32> to vector<8x128xf32>
    %12 = arith.addf %9, %11 : vector<8x128xf32>
    %cst_11 = arith.constant 0.000000e+00 : f32
    %13 = vector.broadcast %cst_11 : f32 to vector<8x128xf32>
    %14 = arith.maximumf %12, %13 : vector<8x128xf32>
    %c0_12 = arith.constant 0 : index
    %c0_13 = arith.constant 0 : index
    %15 = vector.load %arg6[%c0_12, %c0_13] : memref<128x128xf32, #tpu.memory_space<vmem>>, vector<128x128xf32>
    %cst_14 = arith.constant dense<0.000000e+00> : vector<8x128xf32>
    %16 = tpu.matmul %14, %15, %cst_14 {dimension_numbers = #tpu.dot_dimension_numbers<[1], [0], [0], [1], [0, 0, 1, 1], [], []>} : vector<8x128xf32>, vector<128x128xf32>, vector<8x128xf32> -> vector<8x128xf32>
    %c0_15 = arith.constant 0 : index
    %c0_16 = arith.constant 0 : index
    %17 = vector.load %arg7[%c0_15, %c0_16] : memref<1x128xf32, #tpu.memory_space<vmem>>, vector<1x128xf32>
    %18 = vector.broadcast %17 : vector<1x128xf32> to vector<8x128xf32>
    %19 = arith.addf %16, %18 : vector<8x128xf32>
    %cst_17 = arith.constant 0.000000e+00 : f32
    %20 = vector.broadcast %cst_17 : f32 to vector<8x128xf32>
    %21 = arith.maximumf %19, %20 : vector<8x128xf32>
    %c0_18 = arith.constant 0 : index
    %c0_19 = arith.constant 0 : index
    %22 = vector.load %arg8[%c0_18, %c0_19] : memref<128x128xf32, #tpu.memory_space<vmem>>, vector<128x128xf32>
    %cst_20 = arith.constant dense<0.000000e+00> : vector<8x128xf32>
    %23 = tpu.matmul %21, %22, %cst_20 {dimension_numbers = #tpu.dot_dimension_numbers<[1], [0], [0], [1], [0, 0, 1, 1], [], []>} : vector<8x128xf32>, vector<128x128xf32>, vector<8x128xf32> -> vector<8x128xf32>
    %c0_21 = arith.constant 0 : index
    %c0_22 = arith.constant 0 : index
    %24 = vector.load %arg9[%c0_21, %c0_22] : memref<1x128xf32, #tpu.memory_space<vmem>>, vector<1x128xf32>
    %25 = vector.broadcast %24 : vector<1x128xf32> to vector<8x128xf32>
    %26 = arith.addf %23, %25 : vector<8x128xf32>
    %cst_23 = arith.constant dense<0xFF800000> : vector<8xf32>
    %27 = vector.multi_reduction <maximumf>, %26, %cst_23 [1] : vector<8x128xf32> to vector<8xf32>
    %28 = vector.shape_cast %27 : vector<8xf32> to vector<8x1xf32>
    %29 = vector.broadcast %28 : vector<8x1xf32> to vector<8x128xf32>
    %30 = arith.subf %26, %29 : vector<8x128xf32>
    %31 = math.exp %30 : vector<8x128xf32>
    %cst_24 = arith.constant dense<0.000000e+00> : vector<8xf32>
    %32 = vector.multi_reduction <add>, %31, %cst_24 [1] : vector<8x128xf32> to vector<8xf32>
    %33 = vector.shape_cast %32 : vector<8xf32> to vector<8x1xf32>
    %34 = math.log %33 : vector<8x1xf32>
    %35 = vector.broadcast %34 : vector<8x1xf32> to vector<8x128xf32>
    %36 = arith.subf %30, %35 : vector<8x128xf32>
    %37 = vector.extract_strided_slice %36 {offsets = [0, 0], sizes = [8, 8], strides = [1, 1]} : vector<8x128xf32> to vector<8x8xf32>
    %c0_25 = arith.constant 0 : index
    %c0_26 = arith.constant 0 : index
    %38 = vector.load %arg10[%c0_25, %c0_26] : memref<8x8xf32, #tpu.memory_space<vmem>>, vector<8x8xf32>
    tpu.vector_store %arg10[%c0_25, %c0_26], %37 {strides = array<i32>} : memref<8x8xf32, #tpu.memory_space<vmem>>, vector<8x8xf32>,
    return
  }
  func.func @transform_0(%arg0: i32) -> (i32, i32) {
    %c0_i32 = arith.constant 0 : i32
    %c0_i32_0 = arith.constant 0 : i32
    return %arg0, %c0_i32 : i32, i32
  }
  func.func @transform_1(%arg0: i32) -> (i32, i32) {
    %c0_i32 = arith.constant 0 : i32
    %c0_i32_0 = arith.constant 0 : i32
    %c0_i32_1 = arith.constant 0 : i32
    return %c0_i32, %c0_i32_0 : i32, i32
  }
  func.func @transform_2(%arg0: i32) -> (i32, i32) {
    %c0_i32 = arith.constant 0 : i32
    %c0_i32_0 = arith.constant 0 : i32
    %c0_i32_1 = arith.constant 0 : i32
    return %c0_i32, %c0_i32_0 : i32, i32
  }
  func.func @transform_3(%arg0: i32) -> (i32, i32) {
    %c0_i32 = arith.constant 0 : i32
    %c0_i32_0 = arith.constant 0 : i32
    %c0_i32_1 = arith.constant 0 : i32
    return %c0_i32, %c0_i32_0 : i32, i32
  }
  func.func @transform_4(%arg0: i32) -> (i32, i32) {
    %c0_i32 = arith.constant 0 : i32
    %c0_i32_0 = arith.constant 0 : i32
    %c0_i32_1 = arith.constant 0 : i32
    return %c0_i32, %c0_i32_0 : i32, i32
  }
  func.func @transform_5(%arg0: i32) -> (i32, i32) {
    %c0_i32 = arith.constant 0 : i32
    %c0_i32_0 = arith.constant 0 : i32
    %c0_i32_1 = arith.constant 0 : i32
    return %c0_i32, %c0_i32_0 : i32, i32
  }
  func.func @transform_6(%arg0: i32) -> (i32, i32) {
    %c0_i32 = arith.constant 0 : i32
    %c0_i32_0 = arith.constant 0 : i32
    %c0_i32_1 = arith.constant 0 : i32
    return %c0_i32, %c0_i32_0 : i32, i32
  }
  func.func @transform_7(%arg0: i32) -> (i32, i32) {
    %c0_i32 = arith.constant 0 : i32
    %c0_i32_0 = arith.constant 0 : i32
    %c0_i32_1 = arith.constant 0 : i32
    return %c0_i32, %c0_i32_0 : i32, i32
  }
  func.func @transform_8(%arg0: i32) -> (i32, i32) {
    %c0_i32 = arith.constant 0 : i32
    %c0_i32_0 = arith.constant 0 : i32
    %c0_i32_1 = arith.constant 0 : i32
    return %c0_i32, %c0_i32_0 : i32, i32
  }
  func.func @transform_9(%arg0: i32) -> (i32, i32) {
    %c0_i32 = arith.constant 0 : i32
    %c0_i32_0 = arith.constant 0 : i32
    return %arg0, %c0_i32 : i32, i32
  }
}

</mosaic_0001>

<bundles_post_ra>
// kernel: tpu_custom_call.1
= control target key start
LH: loop header
LB: loop body
LE: loop exit
PB: predicated region body
PF: predicated region fallthrough
CT: control target
= control target key end

     0   :  { %14 = vsyncpa [#allocation3], 0  ;;  %s1097_s0 = inlined_call_operand.hbm [shape: f32[8,32], index: 0, kind: input, shape index: {}]   ;;  %s1098_s1 = inlined_call_operand.hbm [shape: f32[32,128], index: 1, kind: input, shape index: {}]   ;;  %s1099_s2 = inlined_call_operand.vmem [shape: f32[1,128], index: 2, kind: input, shape index: {}]   ;;  %s1100_s3 = inlined_call_operand.hbm [shape: f32[128,128], index: 3, kind: input, shape index: {}]   ;;  %s1101_s4 = inlined_call_operand.vmem [shape: f32[1,128], index: 4, kind: input, shape index: {}]   ;;  %s1102_s5 = inlined_call_operand.hbm [shape: f32[128,128], index: 5, kind: input, shape index: {}]   ;;  %s1103_s6 = inlined_call_operand.vmem [shape: f32[1,128], index: 6, kind: input, shape index: {}]   ;;  %s1104_s7 = inlined_call_operand.hbm [shape: f32[128,128], index: 7, kind: input, shape index: {}]   ;;  %s1105_s8 = inlined_call_operand.vmem [shape: f32[1,128], index: 8, kind: input, shape index: {}]   ;;  %s1106_s9 = inlined_call_operand.hbm [shape: f32[8,8], index: 9, kind: output, shape index: {}]  }
   0x1   :  { %15 = vsyncpa [#allocation6], 0 }
   0x2   :  { %16 = vsyncpa [#allocation9], 0 }
   0x3   :  { %17 = vsyncpa [#allocation4], 0  ;;  %s906_s30 = smov [#allocation5]   ;;  %s766_s13 = scalar_lea.hbm %s1098_s1, 512 }
   0x4   :  { %s33_s10 = sshll.u32 %s906_s30, 4  ;;  %p767_p0 = scmp.ne.s32.totalorder %s1098_s1, %s766_s13  ;;  %s34_s10 = int_to_ptr.vmem [resolvable:$true] %s33_s10 }
   0x5   :  { %p770_p1 = scmp.lt.u32.totalorder %s766_s13, %s1098_s1 }
   0x7   :  { %p772_p2 = pnand %p770_p1, %p767_p0 }
   0x9   :  { %775 = shalt.err (!%p772_p2)
}
   0xa   :  { %s776_s18 = scalar_lea.vmem %s34_s10, 512  ;;  %p781_p4 = scmp.lt.s32.totalorder %s34_s10, %s34_s10 }
   0xb   :  { %p777_p3 = scmp.ne.s32.totalorder %s34_s10, %s776_s18  ;;  %p782_p5 = scmp.lt.s32.totalorder %s776_s18, %s776_s18 }
   0xd   :  { %p783_p6 = por %p782_p5, %p781_p4 }
   0xf   :  { %p784_p7 = pnand %p783_p6, %p777_p3 }
  0x11   :  { %787 = shalt.err (!%p784_p7)
}
  0x12   :  { %s907_s19 = smov 128   ;;  %s908_s20 = smov 8  }
  0x13   :  { %39 = dma.hbm_to_vmem [thread:$0]  %s1098_s1, 512, %s34_s10, [#allocation6], %s907_s19, %s907_s19, %s908_s20  }
  0x14   :  { %s909_s23 = smov [#allocation8]   ;;  %s910_s25 = smov [#allocation2]  }
  0x15   :  { %s61_s24 = sshll.u32 %s909_s23, 4  ;;  %s24_s26 = sshll.u32 %s910_s25, 4  ;;  %s62_s24 = int_to_ptr.vmem [resolvable:$true] %s61_s24  ;;  %s25_s26 = int_to_ptr.vmem [resolvable:$true] %s24_s26 }
  0x16   :  { %s788_s29 = scalar_lea.hbm %s1102_s5, 2048 }
  0x17   :  { %p789_p8 = scmp.ne.s32.totalorder %s1102_s5, %s788_s29  ;;  %p792_p9 = scmp.lt.u32.totalorder %s788_s29, %s1102_s5 }
  0x19   :  { %p794_p10 = pnand %p792_p9, %p789_p8 }
  0x1b   :  { %797 = shalt.err (!%p794_p10)
}
  0x1c   :  { %s798_s1 = scalar_lea.vmem %s62_s24, 2048  ;;  %p803_p12 = scmp.lt.s32.totalorder %s62_s24, %s62_s24 }
  0x1d   :  { %p799_p11 = scmp.ne.s32.totalorder %s62_s24, %s798_s1  ;;  %p804_p13 = scmp.lt.s32.totalorder %s798_s1, %s798_s1 }
  0x1f   :  { %p805_p0 = por %p804_p13, %p803_p12 }
  0x21   :  { %p806_p1 = pnand %p805_p0, %p799_p11 }
  0x23   :  { %809 = shalt.err (!%p806_p1)
}
  0x24   :  { %67 = dma.hbm_to_vmem [thread:$0]  %s1102_s5, 2048, %s62_s24, [#allocation9], %s907_s19, %s907_s19, %s908_s20  }
  0x25   :  { %s810_s17 = scalar_lea.hbm %s1097_s0, 128 }
  0x26   :  { %p811_p2 = scmp.ne.s32.totalorder %s1097_s0, %s810_s17  ;;  %p814_p3 = scmp.lt.u32.totalorder %s810_s17, %s1097_s0 }
  0x28   :  { %p816_p4 = pnand %p814_p3, %p811_p2 }
  0x2a   :  { %819 = shalt.err (!%p816_p4)
}
  0x2b   :  { %s820_s25 = scalar_lea.vmem %s25_s26, 128  ;;  %p825_p6 = scmp.lt.s32.totalorder %s25_s26, %s25_s26 }
  0x2c   :  { %p821_p5 = scmp.ne.s32.totalorder %s25_s26, %s820_s25  ;;  %p826_p7 = scmp.lt.s32.totalorder %s820_s25, %s820_s25 }
  0x2e   :  { %p827_p8 = por %p826_p7, %p825_p6 }
  0x30   :  { %p828_p9 = pnand %p827_p8, %p821_p5 }
  0x32   :  { %831 = shalt.err (!%p828_p9)
}
  0x33   :  { %27 = dma.hbm_to_vmem [thread:$0]  %s1097_s0, 128, %s25_s26, [#allocation3]  }
  0x34   :  { %s911_s27 = smov [#allocation7]   ;;  %s912_s29 = smov [#allocation10]  }
  0x35   :  { %s47_s28 = sshll.u32 %s911_s27, 4  ;;  %s75_s30 = sshll.u32 %s912_s29, 4  ;;  %s48_s28 = int_to_ptr.vmem [resolvable:$true] %s47_s28  ;;  %s76_s30 = int_to_ptr.vmem [resolvable:$true] %s75_s30 }
  0x36   :  { %s832_s13 = scalar_lea.hbm %s1100_s3, 2048 }
  0x37   :  { %p833_p10 = scmp.ne.s32.totalorder %s1100_s3, %s832_s13  ;;  %p836_p11 = scmp.lt.u32.totalorder %s832_s13, %s1100_s3 }
  0x39   :  { %p838_p12 = pnand %p836_p11, %p833_p10 }
  0x3b   :  { %841 = shalt.err (!%p838_p12)
}
  0x3c   :  { %s842_s0 = scalar_lea.vmem %s48_s28, 2048  ;;  %p847_p0 = scmp.lt.s32.totalorder %s48_s28, %s48_s28 }
  0x3d   :  { %p843_p13 = scmp.ne.s32.totalorder %s48_s28, %s842_s0  ;;  %p848_p1 = scmp.lt.s32.totalorder %s842_s0, %s842_s0 }
  0x3f   :  { %p849_p2 = por %p848_p1, %p847_p0 }
  0x41   :  { %p850_p3 = pnand %p849_p2, %p843_p13 }
  0x43   :  { %853 = shalt.err (!%p850_p3)
}
  0x44   :  { %53 = dma.hbm_to_vmem [thread:$0]  %s1100_s3, 2048, %s48_s28, [#allocation6], %s907_s19, %s907_s19, %s908_s20  }
  0x45   :  { %s854_s21 = scalar_lea.hbm %s1104_s7, 2048 }
  0x46   :  { %p855_p4 = scmp.ne.s32.totalorder %s1104_s7, %s854_s21  ;;  %p858_p5 = scmp.lt.u32.totalorder %s854_s21, %s1104_s7 }
  0x48   :  { %p860_p6 = pnand %p858_p5, %p855_p4 }
  0x4a   :  { %863 = shalt.err (!%p860_p6)
}
  0x4b   :  { %s864_s24 = scalar_lea.vmem %s76_s30, 2048  ;;  %p869_p8 = scmp.lt.s32.totalorder %s76_s30, %s76_s30 }
  0x4c   :  { %p865_p7 = scmp.ne.s32.totalorder %s76_s30, %s864_s24  ;;  %p870_p9 = scmp.lt.s32.totalorder %s864_s24, %s864_s24 }
  0x4e   :  { %p871_p10 = por %p870_p9, %p869_p8 }
  0x50   :  { %p872_p11 = pnand %p871_p10, %p865_p7 }
  0x52   :  { %875 = shalt.err (!%p872_p11)
}
  0x53   :  { %81 = dma.hbm_to_vmem [thread:$0]  %s1104_s7, 2048, %s76_s30, [#allocation9], %s907_s19, %s907_s19, %s908_s20  }
  0x54   :  { %898 = dma.done.wait [#allocation3], 128  }
  0x55   :  { %899 = vsyncadd [#allocation3], 4294967168 }
  0x56   :  { %900 = dma.done.wait [#allocation6], 2560  }
  0x57   :  { %901 = vsyncadd [#allocation6], 4294964736 }
  0x58   :  { %902 = dma.done.wait [#allocation9], 4096  }
  0x59   :  { %903 = vsyncadd [#allocation9], 4294963200  ;;  %v913_v0 = vmov 0.0|0.0   ;;  %vm914_vm0 = vmmov 0   ;;  %v915_v1 = vmov 0.0   ;;  %v100_v2 = vld [vmem:[#allocation5] sm:$0xff] }
  0x5a   :  { %673 = vmatprep.subr.bf16.mxu0 %v913_v0  ;;  %565 = vmatprep.mubr.msk.f32.mxu0 %vm914_vm0, %v915_v1  ;;  %v101_v3 = vld [vmem:[#allocation5 + $0x8] sm:$0xff]  ;;  %v102_v4 = vld [vmem:[#allocation5 + $0x10] sm:$0xff]  ;;  %v103_v6 = vld [vmem:[#allocation5 + $0x18] sm:$0xff]  ;;  %vm111_vm1 = vcmask 261120   ;;  %vm477_vm2 = vcmask 64512  }
  0x5b   :  { %679 = vmatprep.subr.bf16.mxu1 %v913_v0  ;;  %600 = vmatprep.mubr.msk.f32.mxu1 %vm914_vm0, %v915_v1  ;;  %v674_v5 = vpack.c.bf16 %v101_v3, %v100_v2  ;;  %v186_v7 = vld [vmem:[#allocation7] sm:$0xff]  ;;  %v187_v8 = vld [vmem:[#allocation7 + $0x8] sm:$0xff]  ;;  %v188_v9 = vld [vmem:[#allocation7 + $0x10] sm:$0xff]  ;;  %v677_v11 = vpack.c.bf16 %v103_v6, %v102_v4 }
  0x5c   :  { %v189_v10 = vld [vmem:[#allocation7 + $0x18] sm:$0xff]  ;;  %v680_v12 = vpack.c.bf16 %v187_v8, %v186_v7  ;;  %v190_v14 = vld [vmem:[#allocation7 + $0x20] sm:$0xff]  ;;  %v191_v15 = vld [vmem:[#allocation7 + $0x28] sm:$0xff] }
  0x5d   :  { %675 = vmatpush3.bf16.msra.mxu0 %v674_v5  ;;  %v683_v13 = vpack.c.bf16 %v189_v10, %v188_v9  ;;  %v99_v16 = vld [vmem:[#allocation2] sm:$0xff]  ;;  %v686_v17 = vpack.c.bf16 %v191_v15, %v190_v14  ;;  %v192_v18 = vld [vmem:[#allocation7 + $0x30] sm:$0xff]  ;;  %v194_v21 = vld [vmem:[#allocation7 + $0x40] sm:$0xff] }
  0x5e   :  { %676 = vmatprep.subr.bf16.mxu0 %v913_v0  ;;  %681 = vmatpush3.bf16.msra.mxu1 %v680_v12  ;;  %v193_v19 = vld [vmem:[#allocation7 + $0x38] sm:$0xff]  ;;  %v195_v22 = vld [vmem:[#allocation7 + $0x48] sm:$0xff]  ;;  %v196_v24 = vld [vmem:[#allocation7 + $0x50] sm:$0xff] }
  0x5f   :  { %682 = vmatprep.subr.bf16.mxu1 %v913_v0  ;;  %v689_v20 = vpack.c.bf16 %v193_v19, %v192_v18  ;;  %v692_v23 = vpack.c.bf16 %v195_v22, %v194_v21  ;;  %v197_v25 = vld [vmem:[#allocation7 + $0x58] sm:$0xff]  ;;  %v198_v27 = vld [vmem:[#allocation7 + $0x60] sm:$0xff]  ;;  %v199_v28 = vld [vmem:[#allocation7 + $0x68] sm:$0xff] }
  0x60   :  { %v695_v26 = vpack.c.bf16 %v197_v25, %v196_v24  ;;  %v698_v29 = vpack.c.bf16 %v199_v28, %v198_v27  ;;  %v200_v30 = vld [vmem:[#allocation7 + $0x70] sm:$0xff]  ;;  %v201_v31 = vld [vmem:[#allocation7 + $0x78] sm:$0xff]  ;;  %v280_v33 = vld [vmem:[#allocation8] sm:$0xff] }
  0x61   :  { %678 = vmatpush3.bf16.msra.mxu0 %v677_v11  ;;  %v701_v32 = vpack.c.bf16 %v201_v31, %v200_v30  ;;  %v281_v34 = vld [vmem:[#allocation8 + $0x8] sm:$0xff]  ;;  %v282_v35 = vld [vmem:[#allocation8 + $0x10] sm:$0xff]  ;;  %v283_v37 = vld [vmem:[#allocation8 + $0x18] sm:$0xff] }
  0x62   :  { %703 = vmatprep.subr.bf16.mxu0 %v913_v0  ;;  %684 = vmatpush3.bf16.msra.mxu1 %v683_v13  ;;  %v704_v36 = vpack.c.bf16 %v281_v34, %v280_v33  ;;  %v707_v38 = vpack.c.bf16 %v283_v37, %v282_v35  ;;  %v284_v39 = vld [vmem:[#allocation8 + $0x20] sm:$0xff]  ;;  %v285_v40 = vld [vmem:[#allocation8 + $0x28] sm:$0xff]  ;;  %v286_v42 = vld [vmem:[#allocation8 + $0x30] sm:$0xff] }
  0x63   :  { %685 = vmatprep.subr.bf16.mxu1 %v913_v0  ;;  %v710_v41 = vpack.c.bf16 %v285_v40, %v284_v39  ;;  %v287_v43 = vld [vmem:[#allocation8 + $0x38] sm:$0xff]  ;;  %v288_v45 = vld [vmem:[#allocation8 + $0x40] sm:$0xff]  ;;  %v289_v46 = vld [vmem:[#allocation8 + $0x48] sm:$0xff] }
  0x64   :  { %566 = vmatmul.mubr.msk.f32.vlgmr.msra.gmra.mrb[0].mxu0 %vm111_vm1, %v99_v16  ;;  %v713_v44 = vpack.c.bf16 %v287_v43, %v286_v42  ;;  %v716_v47 = vpack.c.bf16 %v289_v46, %v288_v45  ;;  %v290_v48 = vld [vmem:[#allocation8 + $0x50] sm:$0xff]  ;;  %v291_v49 = vld [vmem:[#allocation8 + $0x58] sm:$0xff]  ;;  %v292_v51 = vld [vmem:[#allocation8 + $0x60] sm:$0xff] }
  0x65   :  { %635 = vmatprep.mubr.msk.f32.mxu0 %vm914_vm0, %v915_v1  ;;  %705 = vmatpush3.bf16.msra.mxu0 %v704_v36  ;;  %v719_v50 = vpack.c.bf16 %v291_v49, %v290_v48  ;;  %v293_v52 = vld [vmem:[#allocation8 + $0x68] sm:$0xff]  ;;  %v496_v54 = vld [vmem:[%s1099_s2] ss:$0 sm:$0xff]  ;;  %v294_v59 = vld [vmem:[#allocation8 + $0x70] sm:$0xff] }
  0x66   :  { %687 = vmatpush3.bf16.msra.mxu1 %v686_v17  ;;  %706 = vmatprep.subr.bf16.mxu0 %v913_v0  ;;  %v722_v53 = vpack.c.bf16 %v293_v52, %v292_v51  ;;  %v295_v60 = vld [vmem:[#allocation8 + $0x78] sm:$0xff]  ;;  %v374_v62 = vld [vmem:[#allocation10] sm:$0xff]  ;;  %v375_v63 = vld [vmem:[#allocation10 + $0x8] sm:$0xff] }
  0x67   :  { %688 = vmatprep.subr.bf16.mxu1 %v913_v0  ;;  %v725_v61 = vpack.c.bf16 %v295_v60, %v294_v59  ;;  %v376_v2 = vld [vmem:[#allocation10 + $0x10] sm:$0xff]  ;;  %v728_v3 = vpack.c.bf16 %v375_v63, %v374_v62  ;;  %v377_v4 = vld [vmem:[#allocation10 + $0x18] sm:$0xff]  ;;  %v378_v6 = vld [vmem:[#allocation10 + $0x20] sm:$0xff] }
  0x68   :  { %v731_v5 = vpack.c.bf16 %v377_v4, %v376_v2  ;;  %v379_v7 = vld [vmem:[#allocation10 + $0x28] sm:$0xff]  ;;  %v381_v9 = vld [vmem:[#allocation10 + $0x38] sm:$0xff]  ;;  %v382_v11 = vld [vmem:[#allocation10 + $0x40] sm:$0xff] }
  0x69   :  { %708 = vmatpush3.bf16.msra.mxu0 %v707_v38  ;;  %v734_v8 = vpack.c.bf16 %v379_v7, %v378_v6  ;;  %v383_v12 = vld [vmem:[#allocation10 + $0x48] sm:$0xff]  ;;  %v384_v14 = vld [vmem:[#allocation10 + $0x50] sm:$0xff]  ;;  %v385_v15 = vld [vmem:[#allocation10 + $0x58] sm:$0xff] }
  0x6a   :  { %690 = vmatpush3.bf16.msra.mxu1 %v689_v20  ;;  %709 = vmatprep.subr.bf16.mxu0 %v913_v0  ;;  %v740_v13 = vpack.c.bf16 %v383_v12, %v382_v11  ;;  %v743_v16 = vpack.c.bf16 %v385_v15, %v384_v14  ;;  %v386_v17 = vld [vmem:[#allocation10 + $0x60] sm:$0xff]  ;;  %v387_v18 = vld [vmem:[#allocation10 + $0x68] sm:$0xff]  ;;  %v498_v20 = vld [vmem:[%s1101_s4] ss:$0 sm:$0xff] }
  0x6b   :  { %691 = vmatprep.subr.bf16.mxu1 %v913_v0  ;;  %v746_v19 = vpack.c.bf16 %v387_v18, %v386_v17  ;;  %v388_v25 = vld [vmem:[#allocation10 + $0x70] sm:$0xff]  ;;  %v499_v28 = vld [vmem:[%s1103_s6] ss:$0 sm:$0xff]  ;;  %s916_s6 = smov [#allocation11]  }
  0x6c   :  { %s485_s11 = sshll.u32 %s916_s6, 4  ;;  %s486_s11 = int_to_ptr.vmem [resolvable:$true] %s485_s11 }
  0x6d   :  { %711 = vmatpush3.bf16.msra.mxu0 %v710_v41  ;;  %p881_p13 = scmp.lt.s32.totalorder %s486_s11, %s486_s11 }
  0x6e   :  { %693 = vmatpush3.bf16.msra.mxu1 %v692_v23  ;;  %712 = vmatprep.subr.bf16.mxu0 %v913_v0 }
  0x6f   :  { %694 = vmatprep.subr.bf16.mxu1 %v913_v0 }
  0x71   :  { %714 = vmatpush3.bf16.msra.mxu0 %v713_v44 }
  0x72   :  { %696 = vmatpush3.bf16.msra.mxu1 %v695_v26  ;;  %715 = vmatprep.subr.bf16.mxu0 %v913_v0  ;;  %v389_v26 = vld [vmem:[#allocation10 + $0x78] sm:$0xff] }
  0x73   :  { %697 = vmatprep.subr.bf16.mxu1 %v913_v0  ;;  %v749_v27 = vpack.c.bf16 %v389_v26, %v388_v25 }
  0x75   :  { %717 = vmatpush3.bf16.msra.mxu0 %v716_v47 }
  0x76   :  { %699 = vmatpush3.bf16.msra.mxu1 %v698_v29  ;;  %718 = vmatprep.subr.bf16.mxu0 %v913_v0 }
  0x77   :  { %700 = vmatprep.subr.bf16.mxu1 %v913_v0 }
  0x79   :  { %720 = vmatpush3.bf16.msra.mxu0 %v719_v50 }
  0x7a   :  { %702 = vmatpush3.bf16.msra.mxu1 %v701_v32  ;;  %721 = vmatprep.subr.bf16.mxu0 %v913_v0  ;;  %v500_v32 = vld [vmem:[%s1105_s8] ss:$0 sm:$0xff]  ;;  %s876_s8 = scalar_lea.vmem %s486_s11, 128 }
  0x7b   :  { %727 = vmatprep.subr.bf16.mxu1 %v913_v0  ;;  %p877_p12 = scmp.ne.s32.totalorder %s486_s11, %s876_s8  ;;  %p882_p0 = scmp.lt.s32.totalorder %s876_s8, %s876_s8 }
  0x7d   :  { %723 = vmatpush3.bf16.msra.mxu0 %v722_v53  ;;  %p883_p1 = por %p882_p0, %p881_p13 }
  0x7e   :  { %724 = vmatprep.subr.bf16.mxu0 %v913_v0 }
  0x7f   :  { %p884_p2 = pnand %p883_p1, %p877_p12 }
  0x81   :  { %726 = vmatpush3.bf16.msra.mxu0 %v725_v61 }
 0x137   :  { %v181_v55 = vpop.f32.mrb[0].mxu0 }
 0x138   :  { %v182_v56 = vadd.f32 %v496_v54, %v181_v55  ;;  %v567_v57 = vpop.f32.mrb[1].mxu0 }
 0x13a   :  { %v185_v58 = vmax.f32 %v182_v56, 0.0 }
 0x13c   :  { %601 = vmatmul.mubr.f32.vlgmr.msra.gmra.mrb[0].mxu1 %v185_v58 }
 0x13d   :  { %670 = vmatprep.mubr.msk.f32.mxu1 %vm914_vm0, %v915_v1  ;;  %729 = vmatpush3.bf16.msra.mxu1 %v728_v3  ;;  %v380_v1 = vld [vmem:[#allocation10 + $0x30] sm:$0xff] }
 0x13e   :  { %730 = vmatprep.subr.bf16.mxu1 %v913_v0  ;;  %v737_v10 = vpack.c.bf16 %v381_v9, %v380_v1 }
 0x141   :  { %732 = vmatpush3.bf16.msra.mxu1 %v731_v5 }
 0x142   :  { %733 = vmatprep.subr.bf16.mxu1 %v913_v0 }
 0x145   :  { %735 = vmatpush3.bf16.msra.mxu1 %v734_v8 }
 0x146   :  { %736 = vmatprep.subr.bf16.mxu1 %v913_v0 }
 0x149   :  { %738 = vmatpush3.bf16.msra.mxu1 %v737_v10 }
 0x14a   :  { %739 = vmatprep.subr.bf16.mxu1 %v913_v0 }
 0x14d   :  { %741 = vmatpush3.bf16.msra.mxu1 %v740_v13 }
 0x14e   :  { %742 = vmatprep.subr.bf16.mxu1 %v913_v0 }
 0x151   :  { %744 = vmatpush3.bf16.msra.mxu1 %v743_v16 }
 0x152   :  { %745 = vmatprep.subr.bf16.mxu1 %v913_v0 }
 0x155   :  { %747 = vmatpush3.bf16.msra.mxu1 %v746_v19 }
 0x156   :  { %748 = vmatprep.subr.bf16.mxu1 %v913_v0 }
 0x159   :  { %750 = vmatpush3.bf16.msra.mxu1 %v749_v27 }
 0x20f   :  { %v275_v21 = vpop.f32.mrb[0].mxu1 }
 0x210   :  { %v276_v22 = vadd.f32 %v498_v20, %v275_v21  ;;  %v602_v23 = vpop.f32.mrb[1].mxu1 }
 0x212   :  { %v279_v24 = vmax.f32 %v276_v22, 0.0 }
 0x214   :  { %636 = vmatmul.mubr.f32.vlgmr.msra.gmra.mrb[2].mxu0 %v279_v24 }
 0x2e7   :  { %v369_v29 = vpop.f32.mrb[2].mxu0 }
 0x2e8   :  { %v370_v30 = vadd.f32 %v499_v28, %v369_v29  ;;  %v637_v0 = vpop.f32.mrb[3].mxu0 }
 0x2ea   :  { %v373_v31 = vmax.f32 %v370_v30, 0.0 }
 0x2ec   :  { %671 = vmatmul.mubr.f32.vlgmr.msra.gmra.mrb[2].mxu1 %v373_v31 }
 0x3bf   :  { %v463_v33 = vpop.f32.mrb[2].mxu1 }
 0x3c0   :  { %v464_v34 = vadd.f32 %v500_v32, %v463_v33  ;;  %v672_v35 = vpop.f32.mrb[3].mxu1 }
 0x3c2   :  { %467 = vmax.xlane.f32.xlu0 %v464_v34 }
 0x44f   :  { %v468_v36 = vpop.xlane.xlu0 %467 }
 0x450   :  { %v469_v37 = vsub.f32 %v464_v34, %v468_v36 }
 0x452   :  { %v470_v38 = vmul.f32 1.442695, %v469_v37 }
 0x454   :  { %762 = vpow2.f32 %v470_v38 }
 0x45e   :  { %v763_v39 = vpop.eup %762 }
 0x45f   :  { %472 = vadd.xlane.f32.xlu0 %v763_v39 }
 0x4ec   :  { %v473_v40 = vpop.xlane.xlu0 %472 }
 0x4ed   :  { %764 = vlog2.f32 %v473_v40 }
 0x4f7   :  { %v765_v41 = vpop.eup %764 }
 0x4f8   :  { %v475_v42 = vmul.f32 0.6931472, %v765_v41 }
 0x4fa   :  { %v476_v43 = vsub.f32 %v469_v37, %v475_v42 }
 0x4fc   :  { %478 = vst.msk [vmem:[#allocation11] sm:$0xff] %vm477_vm2, %v476_v43 }
 0x4fd   :  { %887 = shalt.err (!%p884_p2)
}
 0x4fe   :  { %s888_s1 = scalar_lea.hbm %s1106_s9, 128 }
 0x4ff   :  { %p889_p3 = scmp.ne.s32.totalorder %s1106_s9, %s888_s1  ;;  %p892_p4 = scmp.lt.u32.totalorder %s888_s1, %s1106_s9 }
 0x501   :  { %p894_p5 = pnand %p892_p4, %p889_p3 }
 0x503   :  { %897 = shalt.err (!%p894_p5)
}
 0x504   :  { %488 = dma.vmem_to_hbm [thread:$0]  %s486_s11, 128, %s1106_s9, [#allocation4]  }
 0x505   :  { %904 = dma.done.wait [#allocation4], 128  }
 0x506   :  { %905 = vsyncadd [#allocation4], 4294967168 }
 0x507   :  { %492 = vsyncpa [#allocation3], 1 }
 0x508   :  { %493 = vsyncpa [#allocation6], 1 }
 0x509   :  { %494 = vsyncpa [#allocation9], 1 }
 0x50a   :  { %495 = vsyncpa [#allocation4], 1 }

</bundles_post_ra>
